<compile_context>
chip_gen: v5e
topology: v5e:2x2
jax: 0.10.0
libtpu: 0.0.40
codegen_flags: <defaults>
</compile_context>

<pallas_src>
import jax
import jax.numpy as jnp
from jax.experimental import pallas as pl
from jax.experimental.pallas import tpu as pltpu

BN_EPS = 1e-5
HP = 128        # hidden width padded from 100 to the 128-lane tile (exact: pads are zero)
OUT_PAD = 128   # fc3 computed over 128 lanes (lane-dense matmul); sliced before the store


# --------------------------------------------------------------------------
# Parameter padding (hidden 100 -> 128, fc3 output -> 128 lanes)
# --------------------------------------------------------------------------
def pad_params(params, output_dim):
    """Zero-pad hidden dim 100->128 and fc3 output ->128 lanes; weights -> bf16.

    Zero-padded W rows/cols and zero biases/betas keep padded hidden lanes
    exactly zero, so valid outputs are unchanged; padded fc3 bias is -1e30 so
    padded logits contribute nothing to the softmax (bias stays f32)."""
    (w1, b1, g1, be1, w2, b2, g2, be2, w3, b3) = params
    hidden = w1.shape[1]
    ph = HP - hidden
    po = OUT_PAD - output_dim
    w1p = jnp.pad(w1, ((0, 0), (0, ph))).astype(jnp.bfloat16)
    w2p = jnp.pad(w2, ((0, ph), (0, ph))).astype(jnp.bfloat16)
    w3p = jnp.pad(w3, ((0, ph), (0, po))).astype(jnp.bfloat16)
    b1p = jnp.pad(b1, ((0, 0), (0, ph)))
    b2p = jnp.pad(b2, ((0, 0), (0, ph)))
    g1p = jnp.pad(g1, ((0, 0), (0, ph)), constant_values=1.0)
    g2p = jnp.pad(g2, ((0, 0), (0, ph)), constant_values=1.0)
    be1p = jnp.pad(be1, ((0, 0), (0, ph)))
    be2p = jnp.pad(be2, ((0, 0), (0, ph)))
    b3p = jnp.pad(b3, ((0, 0), (0, po)), constant_values=-1e30)
    return (w1p, b1p, g1p, be1p, w2p, b2p, g2p, be2p, w3p, b3p)


# --------------------------------------------------------------------------
# Generation-aware VMEM budget
# --------------------------------------------------------------------------
def _vmem_limit_bytes(rows, input_dim):
    try:
        info = pltpu.get_tpu_info()
        phys = int(getattr(info, "vmem_capacity_bytes", 0)) or 64 * 1024 * 1024
    except Exception:
        phys = 64 * 1024 * 1024                  # conservative: v7x per-TC VMEM
    cap = (phys * 3) // 4                        # headroom for compiler scratch / DMA
    per_row = input_dim * 4 + 8 * HP * 4 + OUT_PAD * 4
    weights = 2 * (input_dim * HP + HP * HP + HP * OUT_PAD) + 8 * HP * 4
    needed = 2 * rows * per_row + weights + 8 * 1024 * 1024
    return int(max(min(needed, cap), min(32 * 1024 * 1024, cap)))


# --------------------------------------------------------------------------
# Fused single-block kernel (small / moderate batches)
# --------------------------------------------------------------------------
def _fused_kernel(x_ref, w1_ref, b1_ref, g1_ref, be1_ref,
                  w2_ref, b2_ref, g2_ref, be2_ref,
                  w3_ref, b3_ref, o_ref):
    # fc1 + ReLU  (x cast to bf16 in-kernel: hides under the matmul)
    x = x_ref[...].astype(jnp.bfloat16)
    h1 = jnp.dot(x, w1_ref[...], preferred_element_type=jnp.float32) + b1_ref[...]
    h1 = jnp.maximum(h1, 0.0)

    # BatchNorm1d #1 (training-mode batch stats; centered two-pass variance)
    mean1 = jnp.mean(h1, axis=0, keepdims=True)
    d1 = h1 - mean1
    var1 = jnp.mean(d1 * d1, axis=0, keepdims=True)
    s1 = g1_ref[...] * jax.lax.rsqrt(var1 + BN_EPS)
    t1 = be1_ref[...] - mean1 * s1
    h1 = h1 * s1 + t1            # row broadcast on the VPU; no MXU fold / relayout

    # fc2 + ReLU
    h2 = jnp.dot(h1.astype(jnp.bfloat16), w2_ref[...],
                 preferred_element_type=jnp.float32) + b2_ref[...]
    h2 = jnp.maximum(h2, 0.0)

    # BatchNorm1d #2
    mean2 = jnp.mean(h2, axis=0, keepdims=True)
    d2 = h2 - mean2
    var2 = jnp.mean(d2 * d2, axis=0, keepdims=True)
    s2 = g2_ref[...] * jax.lax.rsqrt(var2 + BN_EPS)
    t2 = be2_ref[...] - mean2 * s2
    h2 = h2 * s2 + t2

    # fc3 + softmax (padded logits carry bias -1e30 -> exp == 0)
    logits = jnp.dot(h2.astype(jnp.bfloat16), w3_ref[...],
                     preferred_element_type=jnp.float32) + b3_ref[...]
    m = jnp.max(logits, axis=-1, keepdims=True)
    e = jnp.exp(logits - m)
    denom = jnp.sum(e, axis=-1, keepdims=True)
    probs = e * pl.reciprocal(denom, approx=True)
    o_ref[...] = probs[:, :o_ref.shape[1]].astype(o_ref.dtype)


def _forward_fused(x, padded, output_dim):
    B, ID = x.shape
    vmem = pl.BlockSpec(memory_space=pltpu.MemorySpace.VMEM)
    return pl.pallas_call(
        _fused_kernel,
        out_shape=jax.ShapeDtypeStruct((B, output_dim), jnp.float32),
        in_specs=[vmem] * 11,
        out_specs=vmem,
        compiler_params=pltpu.CompilerParams(
            vmem_limit_bytes=_vmem_limit_bytes(B, ID)),
    )(x, *padded)


# --------------------------------------------------------------------------
# Batch-tiled three-pass path (large batches): exact BN stats + pipelined DMA
# --------------------------------------------------------------------------
def _pass_a_kernel(x_ref, w1_ref, b1_ref, h1_ref, stats_ref):
    @pl.when(pl.program_id(0) == 0)
    def _():
        stats_ref[...] = jnp.zeros_like(stats_ref)

    h = jnp.dot(x_ref[...].astype(jnp.bfloat16), w1_ref[...],
                preferred_element_type=jnp.float32) + b1_ref[...]
    h = jnp.maximum(h, 0.0)
    h1_ref[...] = h.astype(h1_ref.dtype)
    # sum / sum-of-squares accumulated in the resident (2, HP) output block
    stats_ref[...] += jnp.concatenate(
        [jnp.sum(h, axis=0, keepdims=True),
         jnp.sum(h * h, axis=0, keepdims=True)], axis=0)


def _pass_b_kernel(h1_ref, s1_ref, t1_ref, w2_ref, b2_ref, h2_ref, stats_ref):
    @pl.when(pl.program_id(0) == 0)
    def _():
        stats_ref[...] = jnp.zeros_like(stats_ref)

    hb = h1_ref[...].astype(jnp.float32) * s1_ref[...] + t1_ref[...]
    h = jnp.dot(hb.astype(jnp.bfloat16), w2_ref[...],
                preferred_element_type=jnp.float32) + b2_ref[...]
    h = jnp.maximum(h, 0.0)
    h2_ref[...] = h.astype(h2_ref.dtype)
    stats_ref[...] += jnp.concatenate(
        [jnp.sum(h, axis=0, keepdims=True),
         jnp.sum(h * h, axis=0, keepdims=True)], axis=0)


def _pass_c_kernel(h2_ref, s2_ref, t2_ref, w3_ref, b3_ref, o_ref):
    hb = h2_ref[...].astype(jnp.float32) * s2_ref[...] + t2_ref[...]
    logits = jnp.dot(hb.astype(jnp.bfloat16), w3_ref[...],
                     preferred_element_type=jnp.float32) + b3_ref[...]
    m = jnp.max(logits, axis=-1, keepdims=True)
    e = jnp.exp(logits - m)
    denom = jnp.sum(e, axis=-1, keepdims=True)
    probs = e * pl.reciprocal(denom, approx=True)
    o_ref[...] = probs[:, :o_ref.shape[1]].astype(o_ref.dtype)


def _bn_scale_shift(stats, gamma, beta, n):
    mean = stats[0:1, :] / n
    # single-pass E[h^2] - mean^2 across tiles (clamped; ReLU outputs are
    # non-extreme so cancellation is benign here)
    var = jnp.maximum(stats[1:2, :] / n - mean * mean, 0.0)
    s = gamma * jax.lax.rsqrt(var + BN_EPS)
    t = beta - mean * s
    return s, t


def _forward_tiled(x, padded, output_dim, tb):
    (w1, b1, g1, be1, w2, b2, g2, be2, w3, b3) = padded
    B, ID = x.shape
    nb = B // tb
    vlim = _vmem_limit_bytes(tb, ID)
    n = jnp.float32(B)
    resident = lambda i: (0, 0)      # weights / bias / stats blocks stay resident

    # ---- pass A: fc1 + ReLU, write h1 (bf16), accumulate BN1 sums ----
    h1, stats1 = pl.pallas_call(
        _pass_a_kernel,
        out_shape=(jax.ShapeDtypeStruct((B, HP), jnp.bfloat16),
                   jax.ShapeDtypeStruct((2, HP), jnp.float32)),
        grid=(nb,),
        in_specs=[pl.BlockSpec((tb, ID), lambda i: (i, 0)),
                  pl.BlockSpec((ID, HP), resident),
                  pl.BlockSpec((1, HP), resident)],
        out_specs=(pl.BlockSpec((tb, HP), lambda i: (i, 0)),
                   pl.BlockSpec((2, HP), resident)),
        compiler_params=pltpu.CompilerParams(
            dimension_semantics=("arbitrary",), vmem_limit_bytes=vlim),
    )(x, w1, b1)
    s1, t1 = _bn_scale_shift(stats1, g1, be1, n)

    # ---- pass B: BN1 + fc2 + ReLU, write h2 (bf16), accumulate BN2 sums ----
    h2, stats2 = pl.pallas_call(
        _pass_b_kernel,
        out_shape=(jax.ShapeDtypeStruct((B, HP), jnp.bfloat16),
                   jax.ShapeDtypeStruct((2, HP), jnp.float32)),
        grid=(nb,),
        in_specs=[pl.BlockSpec((tb, HP), lambda i: (i, 0)),
                  pl.BlockSpec((1, HP), resident),
                  pl.BlockSpec((1, HP), resident),
                  pl.BlockSpec((HP, HP), resident),
                  pl.BlockSpec((1, HP), resident)],
        out_specs=(pl.BlockSpec((tb, HP), lambda i: (i, 0)),
                   pl.BlockSpec((2, HP), resident)),
        compiler_params=pltpu.CompilerParams(
            dimension_semantics=("arbitrary",), vmem_limit_bytes=vlim),
    )(h1, s1, t1, w2, b2)
    s2, t2 = _bn_scale_shift(stats2, g2, be2, n)

    # ---- pass C: BN2 + fc3 + softmax (batch axis megacore-parallel) ----
    out = pl.pallas_call(
        _pass_c_kernel,
        out_shape=jax.ShapeDtypeStruct((B, output_dim), jnp.float32),
        grid=(nb,),
        in_specs=[pl.BlockSpec((tb, HP), lambda i: (i, 0)),
                  pl.BlockSpec((1, HP), resident),
                  pl.BlockSpec((1, HP), resident),
                  pl.BlockSpec((HP, OUT_PAD), resident),
                  pl.BlockSpec((1, OUT_PAD), resident)],
        out_specs=pl.BlockSpec((tb, output_dim), lambda i: (i, 0)),
        compiler_params=pltpu.CompilerParams(
            dimension_semantics=("parallel",), vmem_limit_bytes=vlim),
    )(h2, s2, t2, w3, b3)
    return out


# --------------------------------------------------------------------------
# Public forward
# --------------------------------------------------------------------------
def _pick_batch_tile(B, preferred):
    for tb in (preferred, 2048, 1024, 512, 256, 128, 64, 32, 16, 8):
        if isinstance(tb, int) and 8 <= tb <= B and tb % 8 == 0 and B % tb == 0:
            return tb
    return None


def baseline_forward(x, params, *, fused_max_batch=4096, batch_tile=512):
    output_dim = params[-1].shape[1]
    padded = pad_params(params, output_dim)
    B = x.shape[0]
    tb = _pick_batch_tile(B, batch_tile)
    if B <= fused_max_batch or tb is None:
        return _forward_fused(x, padded, output_dim)
    return _forward_tiled(x, padded, output_dim, tb)


# --------------------------------------------------------------------------
# Init + pure-JAX reference (matches the PyTorch module, training-mode BN)
# --------------------------------------------------------------------------
def init_params(key, input_dim, output_dim, hidden=100):
    ks = jax.random.split(key, 6)

    def linear_init(kw, kb, fan_in, fan_out):
        bound = 1.0 / jnp.sqrt(jnp.float32(fan_in))
        w = jax.random.uniform(kw, (fan_in, fan_out), jnp.float32, -bound, bound)
        b = jax.random.uniform(kb, (1, fan_out), jnp.float32, -bound, bound)
        return w, b

    w1, b1 = linear_init(ks[0], ks[1], input_dim, hidden)
    w2, b2 = linear_init(ks[2], ks[3], hidden, hidden)
    w3, b3 = linear_init(ks[4], ks[5], hidden, output_dim)
    g1 = jnp.ones((1, hidden), jnp.float32)
    be1 = jnp.zeros((1, hidden), jnp.float32)
    g2 = jnp.ones((1, hidden), jnp.float32)
    be2 = jnp.zeros((1, hidden), jnp.float32)
    return (w1, b1, g1, be1, w2, b2, g2, be2, w3, b3)


def reference_forward(x, params):
    (w1, b1, g1, be1, w2, b2, g2, be2, w3, b3) = params

    def bn(h, g, be):
        mu = jnp.mean(h, axis=0, keepdims=True)
        var = jnp.mean((h - mu) ** 2, axis=0, keepdims=True)
        return (h - mu) / jnp.sqrt(var + BN_EPS) * g + be

    h = jnp.maximum(x @ w1 + b1, 0.0)
    h = bn(h, g1, be1)
    h = jnp.maximum(h @ w2 + b2, 0.0)
    h = bn(h, g2, be2)
    logits = h @ w3 + b3
    return jax.nn.softmax(logits, axis=-1)


if __name__ == "__main__":
    input_dim, output_dim, batch = 32, 16, 8
    key = jax.random.PRNGKey(0)
    k_x, k_p, k_x2 = jax.random.split(key, 3)
    x = jax.random.normal(k_x, (batch, input_dim), jnp.float32)
    params = init_params(k_p, input_dim, output_dim)

    # --- small batch: fused single-block path ---
    out = jax.block_until_ready(jax.jit(baseline_forward)(x, params))
    ref = reference_forward(x, params)
    assert out.shape == (batch, output_dim)
    # bf16 MXU operands + approx reciprocal loosen the f32 tolerance slightly
    assert jnp.allclose(out, ref, atol=3e-2, rtol=0.0), "fused path mismatch vs reference"
    assert jnp.allclose(jnp.sum(out, axis=-1), 1.0, atol=5e-3), "softmax rows must sum to 1"

    # --- larger batch: exercise the batch-tiled three-pass path (4 tiles) ---
    B2 = 512
    x2 = jax.random.normal(k_x2, (B2, input_dim), jnp.float32)
    tiled_fwd = jax.jit(lambda a, p: baseline_forward(a, p, fused_max_batch=0, batch_tile=128))
    out2 = jax.block_until_ready(tiled_fwd(x2, params))
    ref2 = reference_forward(x2, params)
    assert out2.shape == (B2, output_dim)
    assert jnp.allclose(out2, ref2, atol=3e-2, rtol=0.0), "tiled path mismatch vs reference"
    assert jnp.allclose(jnp.sum(out2, axis=-1), 1.0, atol=5e-3), "softmax rows must sum to 1"

    print("KERNEL_OK")
</pallas_src>

<mosaic_0001>
module attributes {stable_mosaic.version = 11 : i64} {
  func.func @_fused_kernel(%arg0: memref<8x32xf32, #tpu.memory_space<vmem>>, %arg1: memref<32x128xbf16, #tpu.memory_space<vmem>>, %arg2: memref<1x128xf32, #tpu.memory_space<vmem>>, %arg3: memref<1x128xf32, #tpu.memory_space<vmem>>, %arg4: memref<1x128xf32, #tpu.memory_space<vmem>>, %arg5: memref<128x128xbf16, #tpu.memory_space<vmem>>, %arg6: memref<1x128xf32, #tpu.memory_space<vmem>>, %arg7: memref<1x128xf32, #tpu.memory_space<vmem>>, %arg8: memref<1x128xf32, #tpu.memory_space<vmem>>, %arg9: memref<128x128xbf16, #tpu.memory_space<vmem>>, %arg10: memref<1x128xf32, #tpu.memory_space<vmem>>, %arg11: memref<8x16xf32, #tpu.memory_space<vmem>>) attributes {dimension_semantics = [], scalar_prefetch = 0 : i64, scratch_operands = 0 : i64, tpu.core_type = #tpu.core_type<tc>} {
    %c0 = arith.constant 0 : index
    %c0_0 = arith.constant 0 : index
    %0 = vector.load %arg0[%c0, %c0_0] : memref<8x32xf32, #tpu.memory_space<vmem>>, vector<8x32xf32>
    %1 = arith.truncf %0 : vector<8x32xf32> to vector<8x32xbf16>
    %c0_1 = arith.constant 0 : index
    %c0_2 = arith.constant 0 : index
    %2 = vector.load %arg1[%c0_1, %c0_2] : memref<32x128xbf16, #tpu.memory_space<vmem>>, vector<32x128xbf16>
    %cst = arith.constant dense<0.000000e+00> : vector<8x128xf32>
    %3 = tpu.matmul %1, %2, %cst {dimension_numbers = #tpu.dot_dimension_numbers<[1], [0], [0], [1], [0, 0, 1, 1], [], []>} : vector<8x32xbf16>, vector<32x128xbf16>, vector<8x128xf32> -> vector<8x128xf32>
    %c0_3 = arith.constant 0 : index
    %c0_4 = arith.constant 0 : index
    %4 = vector.load %arg2[%c0_3, %c0_4] : memref<1x128xf32, #tpu.memory_space<vmem>>, vector<1x128xf32>
    %5 = vector.broadcast %4 : vector<1x128xf32> to vector<8x128xf32>
    %6 = arith.addf %3, %5 : vector<8x128xf32>
    %cst_5 = arith.constant 0.000000e+00 : f32
    %7 = vector.broadcast %cst_5 : f32 to vector<8x128xf32>
    %8 = arith.maximumf %6, %7 : vector<8x128xf32>
    %cst_6 = arith.constant dense<0.000000e+00> : vector<128xf32>
    %9 = vector.multi_reduction <add>, %8, %cst_6 [0] : vector<8x128xf32> to vector<128xf32>
    %10 = vector.shape_cast %9 : vector<128xf32> to vector<1x128xf32>
    %cst_7 = arith.constant 8.000000e+00 : f32
    %11 = vector.broadcast %cst_7 : f32 to vector<1x128xf32>
    %12 = arith.divf %10, %11 : vector<1x128xf32>
    %13 = vector.broadcast %12 : vector<1x128xf32> to vector<8x128xf32>
    %14 = arith.subf %8, %13 : vector<8x128xf32>
    %15 = arith.mulf %14, %14 : vector<8x128xf32>
    %cst_8 = arith.constant dense<0.000000e+00> : vector<128xf32>
    %16 = vector.multi_reduction <add>, %15, %cst_8 [0] : vector<8x128xf32> to vector<128xf32>
    %17 = vector.shape_cast %16 : vector<128xf32> to vector<1x128xf32>
    %cst_9 = arith.constant 8.000000e+00 : f32
    %18 = vector.broadcast %cst_9 : f32 to vector<1x128xf32>
    %19 = arith.divf %17, %18 : vector<1x128xf32>
    %c0_10 = arith.constant 0 : index
    %c0_11 = arith.constant 0 : index
    %20 = vector.load %arg3[%c0_10, %c0_11] : memref<1x128xf32, #tpu.memory_space<vmem>>, vector<1x128xf32>
    %cst_12 = arith.constant 9.99999974E-6 : f32
    %21 = vector.broadcast %cst_12 : f32 to vector<1x128xf32>
    %22 = arith.addf %19, %21 : vector<1x128xf32>
    %23 = math.rsqrt %22 : vector<1x128xf32>
    %24 = arith.mulf %20, %23 : vector<1x128xf32>
    %c0_13 = arith.constant 0 : index
    %c0_14 = arith.constant 0 : index
    %25 = vector.load %arg4[%c0_13, %c0_14] : memref<1x128xf32, #tpu.memory_space<vmem>>, vector<1x128xf32>
    %26 = arith.mulf %12, %24 : vector<1x128xf32>
    %27 = arith.subf %25, %26 : vector<1x128xf32>
    %28 = vector.broadcast %24 : vector<1x128xf32> to vector<8x128xf32>
    %29 = arith.mulf %8, %28 : vector<8x128xf32>
    %30 = vector.broadcast %27 : vector<1x128xf32> to vector<8x128xf32>
    %31 = arith.addf %29, %30 : vector<8x128xf32>
    %32 = arith.truncf %31 : vector<8x128xf32> to vector<8x128xbf16>
    %c0_15 = arith.constant 0 : index
    %c0_16 = arith.constant 0 : index
    %33 = vector.load %arg5[%c0_15, %c0_16] : memref<128x128xbf16, #tpu.memory_space<vmem>>, vector<128x128xbf16>
    %cst_17 = arith.constant dense<0.000000e+00> : vector<8x128xf32>
    %34 = tpu.matmul %32, %33, %cst_17 {dimension_numbers = #tpu.dot_dimension_numbers<[1], [0], [0], [1], [0, 0, 1, 1], [], []>} : vector<8x128xbf16>, vector<128x128xbf16>, vector<8x128xf32> -> vector<8x128xf32>
    %c0_18 = arith.constant 0 : index
    %c0_19 = arith.constant 0 : index
    %35 = vector.load %arg6[%c0_18, %c0_19] : memref<1x128xf32, #tpu.memory_space<vmem>>, vector<1x128xf32>
    %36 = vector.broadcast %35 : vector<1x128xf32> to vector<8x128xf32>
    %37 = arith.addf %34, %36 : vector<8x128xf32>
    %cst_20 = arith.constant 0.000000e+00 : f32
    %38 = vector.broadcast %cst_20 : f32 to vector<8x128xf32>
    %39 = arith.maximumf %37, %38 : vector<8x128xf32>
    %cst_21 = arith.constant dense<0.000000e+00> : vector<128xf32>
    %40 = vector.multi_reduction <add>, %39, %cst_21 [0] : vector<8x128xf32> to vector<128xf32>
    %41 = vector.shape_cast %40 : vector<128xf32> to vector<1x128xf32>
    %cst_22 = arith.constant 8.000000e+00 : f32
    %42 = vector.broadcast %cst_22 : f32 to vector<1x128xf32>
    %43 = arith.divf %41, %42 : vector<1x128xf32>
    %44 = vector.broadcast %43 : vector<1x128xf32> to vector<8x128xf32>
    %45 = arith.subf %39, %44 : vector<8x128xf32>
    %46 = arith.mulf %45, %45 : vector<8x128xf32>
    %cst_23 = arith.constant dense<0.000000e+00> : vector<128xf32>
    %47 = vector.multi_reduction <add>, %46, %cst_23 [0] : vector<8x128xf32> to vector<128xf32>
    %48 = vector.shape_cast %47 : vector<128xf32> to vector<1x128xf32>
    %cst_24 = arith.constant 8.000000e+00 : f32
    %49 = vector.broadcast %cst_24 : f32 to vector<1x128xf32>
    %50 = arith.divf %48, %49 : vector<1x128xf32>
    %c0_25 = arith.constant 0 : index
    %c0_26 = arith.constant 0 : index
    %51 = vector.load %arg7[%c0_25, %c0_26] : memref<1x128xf32, #tpu.memory_space<vmem>>, vector<1x128xf32>
    %cst_27 = arith.constant 9.99999974E-6 : f32
    %52 = vector.broadcast %cst_27 : f32 to vector<1x128xf32>
    %53 = arith.addf %50, %52 : vector<1x128xf32>
    %54 = math.rsqrt %53 : vector<1x128xf32>
    %55 = arith.mulf %51, %54 : vector<1x128xf32>
    %c0_28 = arith.constant 0 : index
    %c0_29 = arith.constant 0 : index
    %56 = vector.load %arg8[%c0_28, %c0_29] : memref<1x128xf32, #tpu.memory_space<vmem>>, vector<1x128xf32>
    %57 = arith.mulf %43, %55 : vector<1x128xf32>
    %58 = arith.subf %56, %57 : vector<1x128xf32>
    %59 = vector.broadcast %55 : vector<1x128xf32> to vector<8x128xf32>
    %60 = arith.mulf %39, %59 : vector<8x128xf32>
    %61 = vector.broadcast %58 : vector<1x128xf32> to vector<8x128xf32>
    %62 = arith.addf %60, %61 : vector<8x128xf32>
    %63 = arith.truncf %62 : vector<8x128xf32> to vector<8x128xbf16>
    %c0_30 = arith.constant 0 : index
    %c0_31 = arith.constant 0 : index
    %64 = vector.load %arg9[%c0_30, %c0_31] : memref<128x128xbf16, #tpu.memory_space<vmem>>, vector<128x128xbf16>
    %cst_32 = arith.constant dense<0.000000e+00> : vector<8x128xf32>
    %65 = tpu.matmul %63, %64, %cst_32 {dimension_numbers = #tpu.dot_dimension_numbers<[1], [0], [0], [1], [0, 0, 1, 1], [], []>} : vector<8x128xbf16>, vector<128x128xbf16>, vector<8x128xf32> -> vector<8x128xf32>
    %c0_33 = arith.constant 0 : index
    %c0_34 = arith.constant 0 : index
    %66 = vector.load %arg10[%c0_33, %c0_34] : memref<1x128xf32, #tpu.memory_space<vmem>>, vector<1x128xf32>
    %67 = vector.broadcast %66 : vector<1x128xf32> to vector<8x128xf32>
    %68 = arith.addf %65, %67 : vector<8x128xf32>
    %cst_35 = arith.constant dense<0xFF800000> : vector<8xf32>
    %69 = vector.multi_reduction <maximumf>, %68, %cst_35 [1] : vector<8x128xf32> to vector<8xf32>
    %70 = vector.shape_cast %69 : vector<8xf32> to vector<8x1xf32>
    %71 = vector.broadcast %70 : vector<8x1xf32> to vector<8x128xf32>
    %72 = arith.subf %68, %71 : vector<8x128xf32>
    %73 = math.exp %72 : vector<8x128xf32>
    %cst_36 = arith.constant dense<0.000000e+00> : vector<8xf32>
    %74 = vector.multi_reduction <add>, %73, %cst_36 [1] : vector<8x128xf32> to vector<8xf32>
    %75 = vector.shape_cast %74 : vector<8xf32> to vector<8x1xf32>
    %76 = tpu.reciprocal %75 {approx = true} : vector<8x1xf32> -> vector<8x1xf32>
    %77 = vector.broadcast %76 : vector<8x1xf32> to vector<8x128xf32>
    %78 = arith.mulf %73, %77 : vector<8x128xf32>
    %79 = vector.extract_strided_slice %78 {offsets = [0, 0], sizes = [8, 16], strides = [1, 1]} : vector<8x128xf32> to vector<8x16xf32>
    %c0_37 = arith.constant 0 : index
    %c0_38 = arith.constant 0 : index
    %80 = vector.load %arg11[%c0_37, %c0_38] : memref<8x16xf32, #tpu.memory_space<vmem>>, vector<8x16xf32>
    tpu.vector_store %arg11[%c0_37, %c0_38], %79 {strides = array<i32>} : memref<8x16xf32, #tpu.memory_space<vmem>>, vector<8x16xf32>,
    return
  }
}

</mosaic_0001>

<bundles_post_ra>
// kernel: baseline_forward.1
= control target key start
LH: loop header
LB: loop body
LE: loop exit
PB: predicated region body
PF: predicated region fallthrough
CT: control target
= control target key end

     0   :  { %s640_s0 = inlined_call_operand.vmem [shape: f32[8,32], index: 0, kind: input, shape index: {}]   ;;  %s641_s1 = inlined_call_operand.vmem [shape: bf16[32,128], index: 1, kind: input, shape index: {}]   ;;  %s642_s2 = inlined_call_operand.vmem [shape: f32[1,128], index: 2, kind: input, shape index: {}]   ;;  %s643_s3 = inlined_call_operand.vmem [shape: f32[1,128], index: 3, kind: input, shape index: {}]   ;;  %s644_s4 = inlined_call_operand.vmem [shape: f32[1,128], index: 4, kind: input, shape index: {}]   ;;  %s645_s5 = inlined_call_operand.vmem [shape: bf16[128,128], index: 5, kind: input, shape index: {}]   ;;  %s646_s6 = inlined_call_operand.vmem [shape: f32[1,128], index: 6, kind: input, shape index: {}]   ;;  %s647_s7 = inlined_call_operand.vmem [shape: f32[1,128], index: 7, kind: input, shape index: {}]   ;;  %s648_s8 = inlined_call_operand.vmem [shape: f32[1,128], index: 8, kind: input, shape index: {}]   ;;  %s649_s9 = inlined_call_operand.vmem [shape: bf16[128,128], index: 9, kind: input, shape index: {}]   ;;  %s650_s10 = inlined_call_operand.vmem [shape: f32[1,128], index: 10, kind: input, shape index: {}]   ;;  %s651_s11 = inlined_call_operand.hbm [shape: f32[8,16], index: 11, kind: output, shape index: {}]  }
   0x1   :  { %v433_v0 = vld [vmem:[%s641_s1 + $0x8] sm:$0xff]  ;;  %v432_v1 = vld [vmem:[%s641_s1] sm:$0xff] }
   0x2   :  { %72 = vmatpush.bf16.msra.mxu0 %v433_v0  ;;  %v40_v2 = vld [vmem:[%s640_s0] sm:$0xff] }
   0x3   :  { %16 = vsyncpa [#allocation3], 0  ;;  %v41_v3 = vpack.c.bf16 %v40_v2, %v40_v2  ;;  %vm62_vm0 = vcmask 261120   ;;  %v441_v4 = vld [vmem:[%s645_s5 + $0x38] sm:$0xff]  ;;  %v440_v5 = vld [vmem:[%s645_s5 + $0x30] sm:$0xff]  ;;  %v491_v8 = vmov 8.0  }
   0x4   :  { %196 = vmatpush.bf16.msra.mxu1 %v441_v4  ;;  %v439_v6 = vld [vmem:[%s645_s5 + $0x28] sm:$0xff]  ;;  %v438_v7 = vld [vmem:[%s645_s5 + $0x20] sm:$0xff]  ;;  %455 = vrcp.f32 %v491_v8  ;;  %v437_v9 = vld [vmem:[%s645_s5 + $0x18] sm:$0xff]  ;;  %s350_s21 = sshll.u32 %s651_s11, 4  ;;  %vm341_vm8 = vcmask 130048   ;;  %s351_s21 = int_to_ptr.hbm [resolvable:$true] %s350_s21 }
   0x5   :  { %v452_v11 = vld [vmem:[%s642_s2] ss:$0 sm:$0xff]  ;;  %v436_v12 = vld [vmem:[%s645_s5 + $0x10] sm:$0xff]  ;;  %v435_v16 = vld [vmem:[%s645_s5 + $0x8] sm:$0xff] }
   0x6   :  { %73 = vmatpush.bf16.msra.mxu0 %v432_v1  ;;  %v434_v20 = vld [vmem:[%s645_s5] sm:$0xff]  ;;  %v449_v58 = vld [vmem:[%s649_s9 + $0x38] sm:$0xff]  ;;  %v448_v59 = vld [vmem:[%s649_s9 + $0x30] sm:$0xff] }
   0x7   :  { %v103_v46 = vld [vmem:[%s643_s3] sm:$0x1]  ;;  %319 = vmatpush.bf16.msra.mxu2 %v449_v58  ;;  %v447_v60 = vld [vmem:[%s649_s9 + $0x28] sm:$0xff]  ;;  %v445_v62 = vld [vmem:[%s649_s9 + $0x18] sm:$0xff] }
   0x8   :  { %197 = vmatpush.bf16.msra.mxu1 %v440_v5  ;;  %v116_v50 = vld [vmem:[%s644_s4] sm:$0x1]  ;;  %v444_v0 = vld [vmem:[%s649_s9 + $0x10] sm:$0xff] }
   0x9   :  { %367 = vmatmul.msk.bf16.vlgmr.msra.gmra.mxu0 %vm62_vm0, %v41_v3  ;;  %v446_v61 = vld [vmem:[%s649_s9 + $0x20] sm:$0xff]  ;;  %v443_v3 = vld [vmem:[%s649_s9 + $0x8] sm:$0xff] }
   0xa   :  { %v456_v10 = vpop.eup %455  ;;  %v453_v63 = vld [vmem:[%s646_s6] ss:$0 sm:$0xff] }
   0xb   :  { %v87_v13 = vmul.f32 8.0, %v456_v10  ;;  %vm91_vm1 = vweird.f32 %v456_v10  ;;  %320 = vmatpush.bf16.msra.mxu2 %v448_v59 }
   0xc   :  { %198 = vmatpush.bf16.msra.mxu1 %v439_v6  ;;  %v442_v6 = vld [vmem:[%s649_s9] sm:$0xff] }
   0xd   :  { %v88_v17 = vsub.f32 1.0, %v87_v13 }
   0xf   :  { %v89_v21 = vmul.f32 %v456_v10, %v88_v17  ;;  %321 = vmatpush.bf16.msra.mxu2 %v447_v60 }
  0x10   :  { %199 = vmatpush.bf16.msra.mxu1 %v438_v7 }
  0x11   :  { %v90_v25 = vadd.f32 %v456_v10, %v89_v21 }
  0x13   :  { %v589_v28 = vsel %vm91_vm1, %v456_v10, %v90_v25  ;;  %322 = vmatpush.bf16.msra.mxu2 %v446_v61 }
  0x14   :  { %200 = vmatpush.bf16.msra.mxu1 %v437_v9 }
  0x17   :  { %323 = vmatpush.bf16.msra.mxu2 %v445_v62 }
  0x18   :  { %201 = vmatpush.bf16.msra.mxu1 %v436_v12 }
  0x1b   :  { %324 = vmatpush.bf16.msra.mxu2 %v444_v0 }
  0x1c   :  { %202 = vmatpush.bf16.msra.mxu1 %v435_v16 }
  0x1f   :  { %325 = vmatpush.bf16.msra.mxu2 %v443_v3 }
  0x20   :  { %203 = vmatpush.bf16.msra.mxu1 %v434_v20 }
  0x23   :  { %326 = vmatpush.bf16.msra.mxu2 %v442_v6 }
  0x86   :  { %v75_v14 = vpop.f32.mrf.mxu0 }
  0x87   :  { %v76_v15 = vadd.f32 %v452_v11, %v75_v14 }
  0x89   :  { %v79_v18 = vmax.f32 %v76_v15, 0.0 }
  0x8b   :  { %v80_v19 = vrot.slane %v79_v18, 4 }
  0x8d   :  { %v81_v22 = vadd.f32 %v80_v19, %v79_v18 }
  0x8e   :  { %v77_v23 = vpop.f32.mrf.mxu0 }
  0x8f   :  { %v82_v24 = vrot.slane %v81_v22, 2 }
  0x91   :  { %v83_v26 = vadd.f32 %v82_v24, %v81_v22 }
  0x93   :  { %v84_v27 = vrot.slane %v83_v26, 1 }
  0x95   :  { %v85_v29 = vadd.f32 %v84_v27, %v83_v26 }
  0x97   :  { %v93_v30 = vmul.f32 %v589_v28, %v85_v29 }
  0x99   :  { %v94_v31 = vsub.f32 %v79_v18, %v93_v30 }
  0x9b   :  { %v95_v32 = vmul.f32 %v94_v31, %v94_v31 }
  0x9d   :  { %v96_v33 = vrot.slane %v95_v32, 4 }
  0x9f   :  { %v97_v34 = vadd.f32 %v96_v33, %v95_v32 }
  0xa1   :  { %v98_v35 = vrot.slane %v97_v34, 2 }
  0xa3   :  { %v99_v36 = vadd.f32 %v98_v35, %v97_v34 }
  0xa5   :  { %v100_v37 = vrot.slane %v99_v36, 1 }
  0xa7   :  { %v101_v38 = vadd.f32 %v100_v37, %v99_v36 }
  0xa9   :  { %v102_v39 = vmul.f32 %v101_v38, %v589_v28 }
  0xab   :  { %v104_v40 = vadd.f32 1e-05, %v102_v39 }
  0xad   :  { %457 = vrsqrt.f32 %v104_v40  ;;  %vm111_vm3 = vweird.f32 %v104_v40 }
  0xb3   :  { %v458_v41 = vpop.eup %457 }
  0xb4   :  { %v106_v42 = vmul.f32 %v458_v41, %v104_v40  ;;  %vm112_vm2 = vweird.f32 %v458_v41 }
  0xb5   :  { %vm113_vm4 = vmor %vm111_vm3, %vm112_vm2 }
  0xb6   :  { %v107_v43 = vmul.f32 %v458_v41, %v106_v42 }
  0xb8   :  { %v108_v44 = vmul.f32 0.5, %v107_v43 }
  0xba   :  { %v109_v45 = vsub.f32 1.5, %v108_v44 }
  0xbc   :  { %v110_v47 = vmul.f32 %v458_v41, %v109_v45 }
  0xbe   :  { %v114_v48 = vsel %vm113_vm4, %v458_v41, %v110_v47  ;;  %v454_v41 = vld [vmem:[%s650_s10] ss:$0 sm:$0xff] }
  0xbf   :  { %v115_v49 = vmul.f32 %v114_v48, %v103_v46 }
  0xc1   :  { %v117_v51 = vmul.f32 %v115_v49, %v93_v30  ;;  %v120_v52 = vperm.slane %v115_v49, 0  ;;  %v226_v30 = vld [vmem:[%s647_s7] sm:$0x1]  ;;  %s492_s7 = smov [#allocation2]  }
  0xc3   :  { %v118_v53 = vsub.f32 %v116_v50, %v117_v51  ;;  %v122_v54 = vmul.f32 %v120_v52, %v79_v18 }
  0xc5   :  { %v124_v55 = vperm.slane %v118_v53, 0 }
  0xc7   :  { %v126_v56 = vadd.f32 %v124_v55, %v122_v54 }
  0xc9   :  { %v127_v57 = vpack.c.bf16 %v126_v56, %v126_v56 }
  0xcb   :  { %204 = vmatmul.bf16.vlgmr.msra.gmra.mxu1 %v127_v57 }
 0x148   :  { %v205_v1 = vpop.f32.mrf.mxu1 }
 0x149   :  { %v206_v2 = vadd.f32 %v453_v63, %v205_v1 }
 0x14b   :  { %v209_v4 = vmax.f32 %v206_v2, 0.0 }
 0x14d   :  { %v210_v5 = vrot.slane %v209_v4, 4 }
 0x14f   :  { %v211_v7 = vadd.f32 %v210_v5, %v209_v4 }
 0x150   :  { %v207_v8 = vpop.f32.mrf.mxu1 }
 0x151   :  { %v212_v9 = vrot.slane %v211_v7, 2 }
 0x153   :  { %v213_v10 = vadd.f32 %v212_v9, %v211_v7 }
 0x155   :  { %v214_v11 = vrot.slane %v213_v10, 1 }
 0x157   :  { %v215_v12 = vadd.f32 %v214_v11, %v213_v10 }
 0x159   :  { %v216_v13 = vmul.f32 %v215_v12, %v589_v28 }
 0x15b   :  { %v217_v14 = vsub.f32 %v209_v4, %v216_v13 }
 0x15d   :  { %v218_v15 = vmul.f32 %v217_v14, %v217_v14 }
 0x15f   :  { %v219_v16 = vrot.slane %v218_v15, 4 }
 0x161   :  { %v220_v17 = vadd.f32 %v219_v16, %v218_v15 }
 0x163   :  { %v221_v18 = vrot.slane %v220_v17, 2 }
 0x165   :  { %v222_v19 = vadd.f32 %v221_v18, %v220_v17 }
 0x167   :  { %v223_v20 = vrot.slane %v222_v19, 1 }
 0x169   :  { %v224_v21 = vadd.f32 %v223_v20, %v222_v19 }
 0x16b   :  { %v225_v22 = vmul.f32 %v224_v21, %v589_v28  ;;  %v239_v28 = vld [vmem:[%s648_s8] sm:$0x1]  ;;  %s348_s8 = sshll.u32 %s492_s7, 4  ;;  %s349_s8 = int_to_ptr.vmem [resolvable:$true] %s348_s8 }
 0x16d   :  { %v227_v23 = vadd.f32 1e-05, %v225_v22 }
 0x16f   :  { %459 = vrsqrt.f32 %v227_v23  ;;  %vm234_vm6 = vweird.f32 %v227_v23 }
 0x175   :  { %v460_v24 = vpop.eup %459 }
 0x176   :  { %v229_v25 = vmul.f32 %v460_v24, %v227_v23  ;;  %vm235_vm5 = vweird.f32 %v460_v24 }
 0x177   :  { %vm236_vm7 = vmor %vm234_vm6, %vm235_vm5 }
 0x178   :  { %v230_v26 = vmul.f32 %v460_v24, %v229_v25 }
 0x17a   :  { %v231_v27 = vmul.f32 0.5, %v230_v26 }
 0x17c   :  { %v232_v29 = vsub.f32 1.5, %v231_v27 }
 0x17e   :  { %v233_v31 = vmul.f32 %v460_v24, %v232_v29 }
 0x180   :  { %v237_v32 = vsel %vm236_vm7, %v460_v24, %v233_v31 }
 0x181   :  { %v238_v33 = vmul.f32 %v237_v32, %v226_v30 }
 0x183   :  { %v240_v34 = vmul.f32 %v238_v33, %v216_v13  ;;  %v243_v35 = vperm.slane %v238_v33, 0 }
 0x185   :  { %v241_v36 = vsub.f32 %v239_v28, %v240_v34  ;;  %v245_v37 = vmul.f32 %v243_v35, %v209_v4 }
 0x187   :  { %v247_v38 = vperm.slane %v241_v36, 0 }
 0x189   :  { %v249_v39 = vadd.f32 %v247_v38, %v245_v37 }
 0x18b   :  { %v250_v40 = vpack.c.bf16 %v249_v39, %v249_v39 }
 0x18d   :  { %327 = vmatmul.bf16.vlgmr.msra.gmra.mxu2 %v250_v40 }
 0x210   :  { %v328_v42 = vpop.f32.mrf.mxu2 }
 0x211   :  { %v329_v43 = vadd.f32 %v454_v41, %v328_v42 }
 0x213   :  { %332 = vmax.xlane.f32.xlu0 %v329_v43 }
 0x218   :  { %v330_v44 = vpop.f32.mrf.mxu2 }
 0x286   :  { %v333_v45 = vpop.xlane.xlu0 %332 }
 0x287   :  { %v334_v46 = vsub.f32 %v329_v43, %v333_v45 }
 0x289   :  { %v335_v47 = vmul.f32 1.442695, %v334_v46 }
 0x28b   :  { %461 = vpow2.f32 %v335_v47 }
 0x291   :  { %v462_v48 = vpop.eup %461 }
 0x292   :  { %337 = vadd.xlane.f32.xlu0 %v462_v48 }
 0x305   :  { %v338_v49 = vpop.xlane.xlu0 %337 }
 0x306   :  { %463 = vrcp.f32 %v338_v49 }
 0x30c   :  { %v464_v50 = vpop.eup %463 }
 0x30d   :  { %v340_v51 = vmul.f32 %v464_v50, %v462_v48 }
 0x30f   :  { %342 = vst.msk [vmem:[#allocation2] sm:$0xff] %vm341_vm8, %v340_v51 }
 0x310   :  { %353 = dma.vmem_to_hbm [thread:$0]  %s349_s8, 128, %s351_s21, [#allocation3]  }
 0x311   :  { %489 = dma.done.wait [#allocation3], 128  }
 0x312   :  { %490 = vsyncadd [#allocation3], 4294967168 }
 0x313   :  { %358 = vsyncpa [#allocation3], 1 }

</bundles_post_ra>
